<compile_context>
chip_gen: v6e
topology: v6e:2x2x1
jax: 0.10.0
libtpu: 0.0.40
codegen_flags: <defaults>
</compile_context>

<pallas_src>
import functools

import jax
import jax.numpy as jnp
from jax.experimental import pallas as pl
from jax.experimental.pallas import tpu as pltpu

_LANE_CHUNK = 512  # h chunk [64, 512] f32 = 32 vregs -> no spilling


def critic_kernel(x_ref, p_ref, out_ref):
    """x_ref: [sd, bb] (batch on lanes), p_ref: [H, sd+3] packed params,
    out_ref: [1, bb] lane-dense value row."""
    sd, bb = x_ref.shape

    w1 = p_ref[:, 0:sd]                # [H, sd]  fc1.weight (PyTorch layout)
    b1 = p_ref[:, sd:sd + 1]           # [H, 1]   fc1.bias
    w2 = p_ref[:, sd + 1:sd + 2]       # [H, 1]   fc2.weight as a column
    b2 = p_ref[0:1, sd + 2:sd + 3]     # [1, 1]   fc2.bias

    def value_chunk(xc):
        # fc1: K = state_dim is tiny -> unrolled VPU broadcast mul-adds
        # ([H,1] * [1,c] broadcasts); no MXU weight-push/drain.
        h = w1[:, 0:1] * xc[0:1, :] + b1
        for k in range(1, sd):
            h = h + w1[:, k:k + 1] * xc[k:k + 1, :]
        h = jnp.maximum(h, 0.0)                          # ReLU
        # fc2: N = 1 -> VPU multiply + sublane (XLU) reduce; skip the MXU.
        return jnp.sum(h * w2, axis=0, keepdims=True) + b2

    # Process the batch in lane chunks so the [H, chunk] intermediate stays
    # within the 64-vreg file for large blocks; stores are 128-lane dense.
    for off in range(0, bb, _LANE_CHUNK):
        c = min(_LANE_CHUNK, bb - off)
        out_ref[:, pl.ds(off, c)] = value_chunk(x_ref[:, pl.ds(off, c)])


def pack_params(fc1_w, fc1_b, fc2_w, fc2_b):
    """Pack PyTorch-layout params into one [H, sd+3] f32 buffer (2 DMAs)."""
    hidden, _ = fc1_w.shape
    return jnp.concatenate(
        [fc1_w.astype(jnp.float32),
         jnp.reshape(fc1_b, (hidden, 1)).astype(jnp.float32),
         jnp.reshape(fc2_w, (hidden, 1)).astype(jnp.float32),
         jnp.full((hidden, 1), jnp.reshape(fc2_b, ()), dtype=jnp.float32)],
        axis=1)


@functools.partial(jax.jit, static_argnames=("block_b",))
def critic_forward(x, params, *, block_b=16384):
    """x: [B, state_dim], params: [H, state_dim+3] f32 -> values [B, 1] f32."""
    x = x.astype(jnp.float32)          # mirrors the torch.tensor(..., f32) cast
    B, sd = x.shape
    hidden = params.shape[0]

    # Batch on the lane axis: dense x tile + lane-dense output stores. The
    # tiny [sd, B] transpose replaces the old pad + out[:B] slice passes.
    xT = x.T

    if B <= block_b:
        bb = B                          # single block: no per-step overhead
    else:
        # >= 2 lane-dense (multiple-of-chunk) blocks so the "parallel" axis
        # shards across both v7x TensorCores; block_b caps the per-block
        # footprint for v7x's smaller (64 MiB) VMEM.
        bb = min(block_b, _LANE_CHUNK * pl.cdiv(pl.cdiv(B, 2), _LANE_CHUNK))
    nb = pl.cdiv(B, bb)                 # ragged last block: OOB reads are
                                        # per-column garbage, OOB writes masked.

    out = pl.pallas_call(
        critic_kernel,
        out_shape=jax.ShapeDtypeStruct((1, B), jnp.float32),
        grid=(nb,),
        in_specs=[
            pl.BlockSpec((sd, bb), lambda i: (0, i)),          # activations^T
            pl.BlockSpec((hidden, sd + 3), lambda i: (0, 0)),  # packed params
        ],
        out_specs=pl.BlockSpec((1, bb), lambda i: (0, i)),     # lane-dense row
        compiler_params=pltpu.CompilerParams(
            dimension_semantics=("parallel",)),
    )(xT, params)

    # (1, B) -> (B, 1): row-major reshape, free.
    return out.reshape(B, 1)


def init_params(key, state_dim, hidden=64):
    """PyTorch-Linear-style uniform init, in PyTorch weight layout."""
    k1, k2, k3, k4 = jax.random.split(key, 4)
    bound1 = 1.0 / jnp.sqrt(jnp.float32(state_dim))
    bound2 = 1.0 / jnp.sqrt(jnp.float32(hidden))
    fc1_w = jax.random.uniform(k1, (hidden, state_dim), jnp.float32, -bound1, bound1)
    fc1_b = jax.random.uniform(k2, (hidden,), jnp.float32, -bound1, bound1)
    fc2_w = jax.random.uniform(k3, (1, hidden), jnp.float32, -bound2, bound2)
    fc2_b = jax.random.uniform(k4, (1,), jnp.float32, -bound2, bound2)
    return fc1_w, fc1_b, fc2_w, fc2_b


def _reference(x, fc1_w, fc1_b, fc2_w, fc2_b):
    h = jnp.maximum(x @ fc1_w.T + fc1_b, 0.0)
    return h @ fc2_w.T + fc2_b


if __name__ == "__main__":
    key = jax.random.PRNGKey(0)
    state_dim, hidden = 4, 64          # CartPole obs -> Critic(4): fc1=64, fc2=1

    kp, kx, kx2 = jax.random.split(key, 3)
    fc1_w, fc1_b, fc2_w, fc2_b = init_params(kp, state_dim, hidden)
    params = pack_params(fc1_w, fc1_b, fc2_w, fc2_b)

    # Small rollout-sized batch: single block, single grid point.
    x_small = jax.random.normal(kx, (8, state_dim), dtype=jnp.float32)
    out_small = jax.block_until_ready(critic_forward(x_small, params))
    ref_small = _reference(x_small, fc1_w, fc1_b, fc2_w, fc2_b)
    assert out_small.shape == (8, 1)
    assert jnp.allclose(out_small, ref_small, atol=1e-5, rtol=1e-5)

    # Larger batch exercising the tiled parallel grid axis + ragged last block.
    x_big = jax.random.normal(kx2, (1000, state_dim), dtype=jnp.float32)
    out_big = jax.block_until_ready(critic_forward(x_big, params, block_b=512))
    ref_big = _reference(x_big, fc1_w, fc1_b, fc2_w, fc2_b)
    assert out_big.shape == (1000, 1)
    assert jnp.allclose(out_big, ref_big, atol=1e-5, rtol=1e-5)

    print("KERNEL_OK")
</pallas_src>

<mosaic_0001>
module attributes {stable_mosaic.version = 11 : i64} {
  func.func @critic_kernel(%arg0: i32, %arg1: memref<4x8xf32, #tpu.memory_space<vmem>>, %arg2: memref<64x7xf32, #tpu.memory_space<vmem>>, %arg3: memref<1x8xf32, #tpu.memory_space<vmem>>) attributes {dimension_semantics = [#tpu.dimension_semantics<parallel>], iteration_bounds = array<i64: 1>, scalar_prefetch = 0 : i64, scratch_operands = 0 : i64, tpu.core_type = #tpu.core_type<tc>, window_params = [{transform_indices = @transform_0, window_bounds = array<i64: 4, 8>}, {pipeline_mode = #tpu.pipeline_mode<synchronous>, transform_indices = @transform_1, window_bounds = array<i64: 64, 7>}, {transform_indices = @transform_2, window_bounds = array<i64: 1, 8>}]} {
    %c0 = arith.constant 0 : index
    %c0_0 = arith.constant 0 : index
    %0 = vector.load %arg2[%c0, %c0_0] : memref<64x7xf32, #tpu.memory_space<vmem>>, vector<64x4xf32>
    %c0_1 = arith.constant 0 : index
    %c4 = arith.constant 4 : index
    %1 = vector.load %arg2[%c0_1, %c4] : memref<64x7xf32, #tpu.memory_space<vmem>>, vector<64x1xf32>
    %c0_2 = arith.constant 0 : index
    %c5 = arith.constant 5 : index
    %2 = vector.load %arg2[%c0_2, %c5] : memref<64x7xf32, #tpu.memory_space<vmem>>, vector<64x1xf32>
    %c0_3 = arith.constant 0 : index
    %c6 = arith.constant 6 : index
    %3 = vector.load %arg2[%c0_3, %c6] : memref<64x7xf32, #tpu.memory_space<vmem>>, vector<1x1xf32>
    %c0_4 = arith.constant 0 : index
    %c0_5 = arith.constant 0 : index
    %4 = vector.load %arg1[%c0_4, %c0_5] : memref<4x8xf32, #tpu.memory_space<vmem>>, vector<4x8xf32>
    %5 = vector.extract_strided_slice %0 {offsets = [0, 0], sizes = [64, 1], strides = [1, 1]} : vector<64x4xf32> to vector<64x1xf32>
    %6 = vector.extract_strided_slice %4 {offsets = [0, 0], sizes = [1, 8], strides = [1, 1]} : vector<4x8xf32> to vector<1x8xf32>
    %7 = vector.broadcast %5 : vector<64x1xf32> to vector<64x8xf32>
    %8 = vector.broadcast %6 : vector<1x8xf32> to vector<64x8xf32>
    %9 = arith.mulf %7, %8 : vector<64x8xf32>
    %10 = vector.broadcast %1 : vector<64x1xf32> to vector<64x8xf32>
    %11 = arith.addf %9, %10 : vector<64x8xf32>
    %12 = vector.extract_strided_slice %0 {offsets = [0, 1], sizes = [64, 1], strides = [1, 1]} : vector<64x4xf32> to vector<64x1xf32>
    %13 = vector.extract_strided_slice %4 {offsets = [1, 0], sizes = [1, 8], strides = [1, 1]} : vector<4x8xf32> to vector<1x8xf32>
    %14 = vector.broadcast %12 : vector<64x1xf32> to vector<64x8xf32>
    %15 = vector.broadcast %13 : vector<1x8xf32> to vector<64x8xf32>
    %16 = arith.mulf %14, %15 : vector<64x8xf32>
    %17 = arith.addf %11, %16 : vector<64x8xf32>
    %18 = vector.extract_strided_slice %0 {offsets = [0, 2], sizes = [64, 1], strides = [1, 1]} : vector<64x4xf32> to vector<64x1xf32>
    %19 = vector.extract_strided_slice %4 {offsets = [2, 0], sizes = [1, 8], strides = [1, 1]} : vector<4x8xf32> to vector<1x8xf32>
    %20 = vector.broadcast %18 : vector<64x1xf32> to vector<64x8xf32>
    %21 = vector.broadcast %19 : vector<1x8xf32> to vector<64x8xf32>
    %22 = arith.mulf %20, %21 : vector<64x8xf32>
    %23 = arith.addf %17, %22 : vector<64x8xf32>
    %24 = vector.extract_strided_slice %0 {offsets = [0, 3], sizes = [64, 1], strides = [1, 1]} : vector<64x4xf32> to vector<64x1xf32>
    %25 = vector.extract_strided_slice %4 {offsets = [3, 0], sizes = [1, 8], strides = [1, 1]} : vector<4x8xf32> to vector<1x8xf32>
    %26 = vector.broadcast %24 : vector<64x1xf32> to vector<64x8xf32>
    %27 = vector.broadcast %25 : vector<1x8xf32> to vector<64x8xf32>
    %28 = arith.mulf %26, %27 : vector<64x8xf32>
    %29 = arith.addf %23, %28 : vector<64x8xf32>
    %cst = arith.constant 0.000000e+00 : f32
    %30 = vector.broadcast %cst : f32 to vector<64x8xf32>
    %31 = arith.maximumf %29, %30 : vector<64x8xf32>
    %32 = vector.broadcast %2 : vector<64x1xf32> to vector<64x8xf32>
    %33 = arith.mulf %31, %32 : vector<64x8xf32>
    %cst_6 = arith.constant dense<0.000000e+00> : vector<8xf32>
    %34 = vector.multi_reduction <add>, %33, %cst_6 [0] : vector<64x8xf32> to vector<8xf32>
    %35 = vector.shape_cast %34 : vector<8xf32> to vector<1x8xf32>
    %36 = vector.broadcast %3 : vector<1x1xf32> to vector<1x8xf32>
    %37 = arith.addf %35, %36 : vector<1x8xf32>
    %c0_7 = arith.constant 0 : index
    %c0_8 = arith.constant 0 : index
    %38 = vector.load %arg3[%c0_7, %c0_8] : memref<1x8xf32, #tpu.memory_space<vmem>>, vector<1x8xf32>
    tpu.vector_store %arg3[%c0_7, %c0_8], %37 {strides = array<i32>} : memref<1x8xf32, #tpu.memory_space<vmem>>, vector<1x8xf32>,
    return
  }
  func.func @transform_0(%arg0: i32) -> (i32, i32) {
    %c0_i32 = arith.constant 0 : i32
    %c0_i32_0 = arith.constant 0 : i32
    return %c0_i32, %arg0 : i32, i32
  }
  func.func @transform_1(%arg0: i32) -> (i32, i32) {
    %c0_i32 = arith.constant 0 : i32
    %c0_i32_0 = arith.constant 0 : i32
    %c0_i32_1 = arith.constant 0 : i32
    return %c0_i32, %c0_i32_0 : i32, i32
  }
  func.func @transform_2(%arg0: i32) -> (i32, i32) {
    %c0_i32 = arith.constant 0 : i32
    %c0_i32_0 = arith.constant 0 : i32
    return %c0_i32, %arg0 : i32, i32
  }
}

</mosaic_0001>

<bundles_post_ra>
// kernel: critic_forward.1
= control target key start
LH: loop header
LB: loop body
LE: loop exit
PB: predicated region body
PF: predicated region fallthrough
CT: control target
= control target key end

     0   :  { %v413_v2 = vmov 0   ;;  %s610_s0 = inlined_call_operand.vmem [shape: f32[4,8], index: 0, kind: input, shape index: {}]   ;;  %s611_s1 = inlined_call_operand.vmem [shape: f32[64,7], index: 1, kind: input, shape index: {}]   ;;  %s612_s2 = inlined_call_operand.hbm [shape: f32[1,8], index: 2, kind: output, shape index: {}]  }
   0x1   :  { %v439_v0 = vld [vmem:[%s611_s1 + $0x10] sm:$0xff]  ;;  %v444_v1 = vld [vmem:[%s611_s1] sm:$0xff]  ;;  %371 = vset.pattern.permute.xlu1 %v413_v2  ;;  %370 = vset.pattern.permute.xlu0 %v413_v2  ;;  %v451_v3 = vld [vmem:[%s611_s1 + $0x18] sm:$0xff] }
   0x2   :  { %34 = vperm.xlu1 %371, %v439_v0   ;;  %24 = vperm.xlu0 %370, %v444_v1   ;;  %v13_v4 = vld [vmem:[%s611_s1 + $0x8] sm:$0xff] }
   0x3   :  { %7 = vsyncpa [#allocation3], 0  ;;  %v460_v5 = vld [vmem:[%s611_s1 + $0x28] sm:$0xff]  ;;  %v16_v6 = vld [vmem:[%s611_s1 + $0x20] sm:$0xff]  ;;  %v414_v9 = vmov 4   ;;  %v415_v10 = vmov 1   ;;  %v62_v18 = vlaneseq }
   0x4   :  { %v469_v7 = vld [vmem:[%s611_s1 + $0x38] sm:$0xff]  ;;  %v474_v8 = vld [vmem:[%s611_s1 + $0x30] sm:$0xff]  ;;  %v416_v11 = vmov 2   ;;  %v417_v12 = vmov 3   ;;  %v418_v13 = vmov 5   ;;  %v419_v14 = vmov 6  }
   0x5   :  { %v20_v15 = vld [vmem:[%s611_s1] sm:$0x1]  ;;  %v63_v21 = vshrl.u32 %v62_v18, 7  ;;  %vm318_vm0 = vcmask 64512   ;;  %vm346_vm1 = vcmask 57344  }
   0x6   :  { %39 = vperm.xlu1 %371, %v451_v3   ;;  %29 = vperm.xlu0 %370, %v13_v4   ;;  %v21_v27 = vld [vmem:[%s610_s0] sm:$0xf]  ;;  %s420_s0 = smov [#allocation2]  }
   0x7   :  { %v64_v24 = vsub.s32 0, %v63_v21  ;;  %v148_v51 = vsub.s32 1, %v63_v21  ;;  %v200_v55 = vsub.s32 2, %v63_v21  ;;  %v252_v60 = vsub.s32 3, %v63_v21  ;;  %s354_s28 = sshll.u32 %s420_s0, 4  ;;  %s355_s28 = int_to_ptr.vmem [resolvable:$true] %s354_s28 }
   0x8   :  { %s391_s29 = scalar_lea.vmem %s355_s28, 16  ;;  %s395_s30 = scalar_lea.vmem %s355_s28, 32 }
   0x9   :  { %v524_v28 = vrot.slane %v21_v27, %v64_v24  ;;  %v545_v54 = vrot.slane %v21_v27, %v148_v51  ;;  %v551_v63 = vrot.slane %v21_v27, %v200_v55  ;;  %p392_p0 = scmp.ne.s32.totalorder %s355_s28, %s391_s29  ;;  %p396_p1 = scmp.lt.s32.totalorder %s355_s28, %s355_s28 }
   0xa   :  { %49 = vperm.xlu1 %371, %v460_v5   ;;  %44 = vperm.xlu0 %370, %v16_v6   ;;  %p397_p2 = scmp.lt.s32.totalorder %s395_s30, %s391_s29 }
   0xc   :  { %p398_p3 = por %p397_p2, %p396_p1 }
   0xe   :  { %59 = vperm.xlu1 %371, %v469_v7   ;;  %54 = vperm.xlu0 %370, %v474_v8   ;;  %p399_p4 = pnand %p398_p3, %p392_p0 }
  0x12   :  { %373 = vset.pattern.permute.xlu1 %v414_v9  ;;  %372 = vset.pattern.permute.xlu0 %v414_v9 }
  0x13   :  { %79 = vperm.xlu1 %373, %v13_v4   ;;  %75 = vperm.xlu0 %372, %v444_v1  }
  0x17   :  { %83 = vperm.xlu1 %373, %v439_v0   ;;  %87 = vperm.xlu0 %372, %v451_v3  }
  0x1b   :  { %91 = vperm.xlu1 %373, %v16_v6   ;;  %95 = vperm.xlu0 %372, %v460_v5  }
  0x1f   :  { %99 = vperm.xlu1 %373, %v474_v8   ;;  %103 = vperm.xlu0 %372, %v469_v7  }
  0x23   :  { %374 = vset.pattern.permute.xlu1 %v415_v10  ;;  %375 = vset.pattern.permute.xlu0 %v415_v10 }
  0x24   :  { %115 = vperm.xlu1 %374, %v444_v1   ;;  %119 = vperm.xlu0 %375, %v13_v4  }
  0x28   :  { %123 = vperm.xlu1 %374, %v439_v0   ;;  %131 = vperm.xlu0 %375, %v16_v6  }
  0x2c   :  { %127 = vperm.xlu1 %374, %v451_v3   ;;  %139 = vperm.xlu0 %375, %v474_v8  }
  0x30   :  { %135 = vperm.xlu1 %374, %v460_v5   ;;  %376 = vset.pattern.permute.xlu0 %v416_v11 }
  0x31   :  { %167 = vperm.xlu0 %376, %v444_v1  }
  0x34   :  { %143 = vperm.xlu1 %374, %v469_v7  }
  0x35   :  { %378 = vset.pattern.permute.xlu0 %v417_v12 }
  0x36   :  { %219 = vperm.xlu0 %378, %v444_v1  }
  0x38   :  { %377 = vset.pattern.permute.xlu1 %v416_v11 }
  0x39   :  { %171 = vperm.xlu1 %377, %v13_v4  }
  0x3a   :  { %227 = vperm.xlu0 %378, %v439_v0  }
  0x3d   :  { %175 = vperm.xlu1 %377, %v439_v0  }
  0x3e   :  { %231 = vperm.xlu0 %378, %v451_v3  }
  0x41   :  { %379 = vset.pattern.permute.xlu1 %v417_v12 }
  0x42   :  { %223 = vperm.xlu1 %379, %v13_v4   ;;  %235 = vperm.xlu0 %378, %v16_v6  }
  0x46   :  { %380 = vset.pattern.permute.xlu1 %v416_v11  ;;  %243 = vperm.xlu0 %378, %v474_v8  }
  0x47   :  { %179 = vperm.xlu1 %380, %v451_v3  }
  0x4a   :  { %385 = vset.pattern.permute.xlu0 %v418_v13 }
  0x4b   :  { %183 = vperm.xlu1 %380, %v16_v6   ;;  %283 = vperm.xlu0 %385, %v13_v4   ;;  %v556_v4 = vrot.slane %v21_v27, %v252_v60 }
  0x4f   :  { %187 = vperm.xlu1 %380, %v460_v5   ;;  %287 = vperm.xlu0 %385, %v439_v0  }
  0x53   :  { %381 = vset.pattern.permute.xlu1 %v418_v13  ;;  %295 = vperm.xlu0 %385, %v16_v6  }
  0x54   :  { %279 = vperm.xlu1 %381, %v444_v1  }
  0x57   :  { %307 = vperm.xlu0 %385, %v469_v7  }
  0x58   :  { %382 = vset.pattern.permute.xlu1 %v416_v11 }
  0x59   :  { %191 = vperm.xlu1 %382, %v474_v8  }
  0x5b   :  { %390 = vset.pattern.permute.xlu0 %v419_v14 }
  0x5d   :  { %383 = vset.pattern.permute.xlu1 %v417_v12 }
  0x5e   :  { %239 = vperm.xlu1 %383, %v460_v5  }
  0x62   :  { %384 = vset.pattern.permute.xlu1 %v416_v11 }
  0x63   :  { %195 = vperm.xlu1 %384, %v469_v7  }
  0x67   :  { %386 = vset.pattern.permute.xlu1 %v418_v13 }
  0x68   :  { %291 = vperm.xlu1 %386, %v451_v3  }
  0x6c   :  { %387 = vset.pattern.permute.xlu1 %v417_v12 }
  0x6d   :  { %247 = vperm.xlu1 %387, %v469_v7  }
  0x71   :  { %388 = vset.pattern.permute.xlu1 %v418_v13 }
  0x72   :  { %299 = vperm.xlu1 %388, %v460_v5  }
  0x76   :  { %303 = vperm.xlu1 %388, %v474_v8  }
  0x7a   :  { %389 = vset.pattern.permute.xlu1 %v419_v14 }
  0x7b   :  { %342 = vperm.xlu1 %389, %v20_v15  }
  0x7d   :  { %v35_v16 = vpop.permute.xlu1 %34  ;;  %v25_v17 = vpop.permute.xlu0 %24 }
  0x7e   :  { %v68_v31 = vmul.f32 %v524_v28, %v35_v16  ;;  %v66_v56 = vmul.f32 %v524_v28, %v25_v17 }
  0x81   :  { %v511_v19 = vpop.permute.xlu1 %39  ;;  %v30_v20 = vpop.permute.xlu0 %29 }
  0x82   :  { %v67_v59 = vmul.f32 %v524_v28, %v30_v20 }
  0x85   :  { %v513_v22 = vpop.permute.xlu1 %49  ;;  %v515_v23 = vpop.permute.xlu0 %44 }
  0x89   :  { %v517_v25 = vpop.permute.xlu1 %59  ;;  %v519_v26 = vpop.permute.xlu0 %54 }
  0x8e   :  { %v80_v29 = vpop.permute.xlu1 %79  ;;  %v76_v30 = vpop.permute.xlu0 %75 }
  0x8f   :  { %v106_v0 = vadd.f32 %v76_v30, %v66_v56  ;;  %v107_v3 = vadd.f32 %v80_v29, %v67_v59 }
  0x92   :  { %v84_v32 = vpop.permute.xlu1 %83  ;;  %v527_v33 = vpop.permute.xlu0 %87 }
  0x93   :  { %v108_v34 = vadd.f32 %v84_v32, %v68_v31 }
  0x96   :  { %v529_v35 = vpop.permute.xlu1 %91  ;;  %v531_v36 = vpop.permute.xlu0 %95 }
  0x9a   :  { %v533_v37 = vpop.permute.xlu1 %99  ;;  %v535_v38 = vpop.permute.xlu0 %103 }
  0x9f   :  { %v116_v39 = vpop.permute.xlu1 %115  ;;  %v120_v40 = vpop.permute.xlu0 %119 }
  0xa0   :  { %v151_v61 = vmul.f32 %v545_v54, %v120_v40  ;;  %v150_v1 = vmul.f32 %v545_v54, %v116_v39 }
  0xa2   :  { %v159_v8 = vadd.f32 %v151_v61, %v107_v3  ;;  %v158_v12 = vadd.f32 %v150_v1, %v106_v0 }
  0xa3   :  { %v124_v41 = vpop.permute.xlu1 %123  ;;  %v132_v42 = vpop.permute.xlu0 %131 }
  0xa4   :  { %v152_v62 = vmul.f32 %v545_v54, %v124_v41  ;;  %v70_v41 = vmul.f32 %v524_v28, %v515_v23 }
  0xa6   :  { %v160_v9 = vadd.f32 %v152_v62, %v108_v34  ;;  %v110_v56 = vadd.f32 %v529_v35, %v70_v41 }
  0xa7   :  { %v128_v43 = vpop.permute.xlu1 %127  ;;  %v537_v44 = vpop.permute.xlu0 %139 }
  0xab   :  { %v539_v45 = vpop.permute.xlu1 %135 }
  0xac   :  { %v168_v46 = vpop.permute.xlu0 %167 }
  0xad   :  { %v202_v10 = vmul.f32 %v551_v63, %v168_v46 }
  0xaf   :  { %v541_v47 = vpop.permute.xlu1 %143  ;;  %v210_v20 = vadd.f32 %v202_v10, %v158_v12  ;;  %v71_v10 = vmul.f32 %v524_v28, %v513_v22 }
  0xb1   :  { %v220_v48 = vpop.permute.xlu0 %219 }
  0xb2   :  { %v254_v13 = vmul.f32 %v556_v4, %v220_v48 }
  0xb4   :  { %v172_v49 = vpop.permute.xlu1 %171  ;;  %v262_v24 = vadd.f32 %v254_v13, %v210_v20 }
  0xb5   :  { %v228_v50 = vpop.permute.xlu0 %227  ;;  %v203_v5 = vmul.f32 %v551_v63, %v172_v49  ;;  %v154_v49 = vmul.f32 %v545_v54, %v132_v42 }
  0xb6   :  { %v256_v15 = vmul.f32 %v556_v4, %v228_v50  ;;  %v270_v39 = vmax.f32 %v262_v24, 0.0 }
  0xb7   :  { %v211_v14 = vadd.f32 %v203_v5, %v159_v8  ;;  %v162_v62 = vadd.f32 %v154_v49, %v110_v56 }
  0xb8   :  { %v176_v52 = vpop.permute.xlu1 %175 }
  0xb9   :  { %v543_v53 = vpop.permute.xlu0 %231  ;;  %v204_v6 = vmul.f32 %v551_v63, %v176_v52  ;;  %v69_v52 = vmul.f32 %v524_v28, %v511_v19 }
  0xba   :  { %v257_v35 = vmul.f32 %v556_v4, %v543_v53  ;;  %v156_v53 = vmul.f32 %v545_v54, %v537_v44 }
  0xbb   :  { %v212_v16 = vadd.f32 %v204_v6, %v160_v9  ;;  %v109_v42 = vadd.f32 %v527_v33, %v69_v52  ;;  %v72_v33 = vmul.f32 %v524_v28, %v519_v26  ;;  %v157_v26 = vmul.f32 %v545_v54, %v541_v47 }
  0xbd   :  { %v224_v57 = vpop.permute.xlu1 %223  ;;  %v236_v58 = vpop.permute.xlu0 %235  ;;  %v264_v29 = vadd.f32 %v256_v15, %v212_v16  ;;  %v73_v15 = vmul.f32 %v524_v28, %v517_v25  ;;  %v112_v22 = vadd.f32 %v533_v37, %v72_v33 }
  0xbe   :  { %v255_v11 = vmul.f32 %v556_v4, %v224_v57  ;;  %v153_v57 = vmul.f32 %v545_v54, %v128_v43  ;;  %v258_v3 = vmul.f32 %v556_v4, %v236_v58  ;;  %v111_v58 = vadd.f32 %v531_v36, %v71_v10 }
  0xbf   :  { %v272_v34 = vmax.f32 %v264_v29, 0.0  ;;  %v113_v44 = vadd.f32 %v535_v38, %v73_v15  ;;  %v164_v24 = vadd.f32 %v156_v53, %v112_v22 }
  0xc0   :  { %v263_v21 = vadd.f32 %v255_v11, %v211_v14  ;;  %v161_v1 = vadd.f32 %v153_v57, %v109_v42 }
  0xc1   :  { %v554_v2 = vpop.permute.xlu0 %243  ;;  %v165_v28 = vadd.f32 %v157_v26, %v113_v44 }
  0xc2   :  { %v180_v7 = vpop.permute.xlu1 %179  ;;  %v271_v30 = vmax.f32 %v263_v21, 0.0  ;;  %v260_v38 = vmul.f32 %v556_v4, %v554_v2 }
  0xc3   :  { %v205_v0 = vmul.f32 %v551_v63, %v180_v7  ;;  %v155_v7 = vmul.f32 %v545_v54, %v539_v45 }
  0xc5   :  { %v213_v43 = vadd.f32 %v205_v0, %v161_v1  ;;  %v163_v16 = vadd.f32 %v155_v7, %v111_v58 }
  0xc6   :  { %v184_v17 = vpop.permute.xlu1 %183  ;;  %v284_v18 = vpop.permute.xlu0 %283 }
  0xc7   :  { %v311_v32 = vmul.f32 %v284_v18, %v271_v30  ;;  %v206_v59 = vmul.f32 %v551_v63, %v184_v17  ;;  %v265_v9 = vadd.f32 %v257_v35, %v213_v43 }
  0xc9   :  { %v320_v50 = vsel %vm318_vm0, %v311_v32, 0.0  ;;  %v214_v19 = vadd.f32 %v206_v59, %v162_v62  ;;  %v273_v14 = vmax.f32 %v265_v9, 0.0 }
  0xca   :  { %v188_v27 = vpop.permute.xlu1 %187  ;;  %v288_v31 = vpop.permute.xlu0 %287 }
  0xcb   :  { %v312_v46 = vmul.f32 %v288_v31, %v272_v34  ;;  %v266_v6 = vadd.f32 %v258_v3, %v214_v19  ;;  %v207_v13 = vmul.f32 %v551_v63, %v188_v27 }
  0xcd   :  { %v322_v23 = vsel %vm318_vm0, %v312_v46, 0.0  ;;  %v274_v11 = vmax.f32 %v266_v6, 0.0  ;;  %v215_v27 = vadd.f32 %v207_v13, %v163_v16 }
  0xce   :  { %v296_v12 = vpop.permute.xlu0 %295 }
  0xcf   :  { %v280_v40 = vpop.permute.xlu1 %279  ;;  %v314_v17 = vmul.f32 %v296_v12, %v274_v11 }
  0xd0   :  { %v310_v48 = vmul.f32 %v280_v40, %v270_v39 }
  0xd1   :  { %v326_v29 = vsel %vm318_vm0, %v314_v17, 0.0 }
  0xd2   :  { %v319_v51 = vsel %vm318_vm0, %v310_v48, 0.0 }
  0xd3   :  { %v321_v55 = vadd.f32 %v320_v50, %v319_v51  ;;  %v308_v51 = vpop.permute.xlu0 %307 }
  0xd4   :  { %v192_v60 = vpop.permute.xlu1 %191 }
  0xd5   :  { %v323_v61 = vadd.f32 %v322_v23, %v321_v55  ;;  %v208_v36 = vmul.f32 %v551_v63, %v192_v60 }
  0xd7   :  { %v216_v47 = vadd.f32 %v208_v36, %v164_v24 }
  0xd9   :  { %v240_v5 = vpop.permute.xlu1 %239  ;;  %v268_v40 = vadd.f32 %v260_v38, %v216_v47 }
  0xda   :  { %v259_v18 = vmul.f32 %v556_v4, %v240_v5 }
  0xdb   :  { %v276_v50 = vmax.f32 %v268_v40, 0.0 }
  0xdc   :  { %v267_v54 = vadd.f32 %v259_v18, %v215_v27 }
  0xde   :  { %v196_v8 = vpop.permute.xlu1 %195 }
  0xdf   :  { %v209_v21 = vmul.f32 %v551_v63, %v196_v8  ;;  %v275_v63 = vmax.f32 %v267_v54, 0.0 }
  0xe1   :  { %v217_v31 = vadd.f32 %v209_v21, %v165_v28 }
  0xe3   :  { %v292_v45 = vpop.permute.xlu1 %291 }
  0xe4   :  { %v313_v20 = vmul.f32 %v292_v45, %v273_v14 }
  0xe6   :  { %v324_v25 = vsel %vm318_vm0, %v313_v20, 0.0 }
  0xe7   :  { %v325_v37 = vadd.f32 %v324_v25, %v323_v61 }
  0xe8   :  { %v248_v30 = vpop.permute.xlu1 %247 }
  0xe9   :  { %v261_v32 = vmul.f32 %v556_v4, %v248_v30  ;;  %v327_v34 = vadd.f32 %v326_v29, %v325_v37 }
  0xeb   :  { %v269_v39 = vadd.f32 %v261_v32, %v217_v31 }
  0xed   :  { %v300_v41 = vpop.permute.xlu1 %299  ;;  %v277_v46 = vmax.f32 %v269_v39, 0.0 }
  0xee   :  { %v315_v48 = vmul.f32 %v300_v41, %v275_v63 }
  0xef   :  { %v317_v56 = vmul.f32 %v308_v51, %v277_v46 }
  0xf0   :  { %v328_v49 = vsel %vm318_vm0, %v315_v48, 0.0 }
  0xf1   :  { %v329_v52 = vadd.f32 %v328_v49, %v327_v34  ;;  %v304_v55 = vpop.permute.xlu1 %303  ;;  %v332_v60 = vsel %vm318_vm0, %v317_v56, 0.0 }
  0xf2   :  { %v316_v57 = vmul.f32 %v304_v55, %v276_v50 }
  0xf4   :  { %v330_v59 = vsel %vm318_vm0, %v316_v57, 0.0 }
  0xf5   :  { %v331_v23 = vadd.f32 %v330_v59, %v329_v52 }
  0xf6   :  { %v343_v1 = vpop.permute.xlu1 %342 }
  0xf7   :  { %v333_v2 = vadd.f32 %v332_v60, %v331_v23 }
  0xf9   :  { %v334_v4 = vrot.slane %v333_v2, 4 }
  0xfb   :  { %v335_v61 = vadd.f32 %v334_v4, %v333_v2 }
  0xfd   :  { %v336_v42 = vrot.slane %v335_v61, 2 }
  0xff   :  { %v337_v62 = vadd.f32 %v336_v42, %v335_v61 }
 0x101   :  { %v338_v0 = vrot.slane %v337_v62, 1 }
 0x103   :  { %v339_v3 = vadd.f32 %v338_v0, %v337_v62 }
 0x105   :  { %v345_v19 = vadd.f32 %v343_v1, %v339_v3 }
 0x107   :  { %347 = vst.msk [vmem:[#allocation2] sm:$0x1] %vm346_vm1, %v345_v19 }
 0x108   :  { %402 = shalt.err (!%p399_p4)
}
 0x109   :  { %357 = dma.vmem_to_hbm [thread:$0]  %s355_s28, 16, %s612_s2, [#allocation3]  }
 0x10a   :  { %411 = dma.done.wait [#allocation3], 16  }
 0x10b   :  { %412 = vsyncadd [#allocation3], 4294967280 }
 0x10c   :  { %361 = vsyncpa [#allocation3], 1 }

</bundles_post_ra>
